<compile_context>
chip_gen: v6e
topology: v6e:2x2x1
jax: 0.10.0
libtpu: 0.0.40
codegen_flags: <defaults>
</compile_context>

<pallas_src>
import jax
import jax.numpy as jnp
from jax.experimental import pallas as pl
from jax.experimental.pallas import tpu as pltpu

LANES = 128
HARD_MAX_ROW_TILE = 8192  # 4 MiB f32 per input per block


def _round_up(x, m):
    return -(-x // m) * m


def _sublane_pack(dtype):
    # Sublane packing multiple: f32 -> 8, bf16/f16 -> 16, int8/uint8/bool -> 32.
    itemsize = jnp.dtype(dtype).itemsize
    return max(8, (4 // max(itemsize, 1)) * 8)


def _tpu_vmem_capacity():
    try:
        cap = getattr(pltpu.get_tpu_info(), "vmem_capacity_bytes", None)
        if isinstance(cap, int) and cap > 0:
            return cap
    except Exception:
        pass
    return 64 << 20  # conservative fallback (v7x per-TC size)


def _num_tensorcores():
    # v7x has 2 TensorCores behind one device; v5e/v6e have 1.
    try:
        kind = jax.devices()[0].device_kind.lower()
    except Exception:
        return 1
    return 2 if "v7" in kind else 1


def _jaccard_kernel(valid_rows_ref, logits_ref, target_ref, inter_ref, total_ref):
    # grid = (shards ["parallel"], steps ["arbitrary", reduction over row blocks])
    j = pl.program_id(1)

    @pl.when(j == 0)
    def _():
        inter_ref[...] = jnp.zeros_like(inter_ref)
        total_ref[...] = jnp.zeros_like(total_ref)

    row_tile = logits_ref.shape[0]
    # Logical (unclamped) block index -> number of valid rows in this block.
    # Out-of-range / duplicate blocks get nvalid <= 0 and contribute nothing.
    blk = pl.program_id(0) * pl.num_programs(1) + j
    nvalid = valid_rows_ref[0] - blk * row_tile

    logits = logits_ref[...].astype(jnp.float32)
    target = target_ref[...].astype(jnp.float32)

    # Single-transcendental sigmoid: sigmoid(x) == 0.5 * (tanh(0.5 * x) + 1).
    pred = 0.5 * (jnp.tanh(0.5 * logits) + 1.0)

    row_ids = jax.lax.broadcasted_iota(jnp.int32, (row_tile, LANES), 0)
    valid = row_ids < nvalid
    pt = jnp.where(valid, pred * target, 0.0)   # pred * target
    ps = jnp.where(valid, pred + target, 0.0)   # pred + target

    # Fold (row_tile, 128) into (g, 8, 128) and sum over the leading axis:
    # pure vreg adds into an (8, 128) accumulator (no per-step cross-lane work).
    g = row_tile // 8
    inter_ref[0] = inter_ref[0] + jnp.sum(pt.reshape(g, 8, LANES), axis=0)
    total_ref[0] = total_ref[0] + jnp.sum(ps.reshape(g, 8, LANES), axis=0)


def jaccard_loss(output, target):
    assert output.shape == target.shape
    n_elems = output.size

    logits = output.reshape(-1)
    tgt = target.reshape(-1)
    if not jnp.issubdtype(logits.dtype, jnp.floating):
        logits = logits.astype(jnp.float32)
    if tgt.dtype == jnp.bool_:
        # Pallas bool refs are finicky; uint8 keeps the narrow 1-byte stream.
        tgt = tgt.astype(jnp.uint8)

    # Lane-dense [rows, 128] view.  Zero-copy reshape when n_elems % 128 == 0
    # (common); otherwise pad <= 127 elements with a sigmoid-neutral value
    # (tanh(0.5*finfo.min) == -1 -> pred == 0) and target 0 so they contribute 0.
    rows = pl.cdiv(n_elems, LANES)
    pad = rows * LANES - n_elems
    if pad > 0:
        neg = float(jnp.finfo(logits.dtype).min)
        logits = jnp.pad(logits, (0, pad), constant_values=neg)
        tgt = jnp.pad(tgt, (0, pad), constant_values=0)
    logits2d = logits.reshape(rows, LANES)
    tgt2d = tgt.reshape(rows, LANES)

    # ---- per-chip tile sizing ----
    pack = max(_sublane_pack(logits2d.dtype), _sublane_pack(tgt2d.dtype))
    in_bytes_per_row = LANES * (
        jnp.dtype(logits2d.dtype).itemsize + jnp.dtype(tgt2d.dtype).itemsize
    )
    # 2 pipeline buffers per input + ~6 f32-sized in-kernel intermediates / row.
    per_row_vmem = 2 * in_bytes_per_row + 6 * LANES * 4
    vmem_cap = _tpu_vmem_capacity()
    block_budget = min(int(vmem_cap * 0.45), 40 << 20)
    budget_rows = max(pack, (block_budget // per_row_vmem) // pack * pack)
    row_tile = min(budget_rows, _round_up(rows, pack), HARD_MAX_ROW_TILE)

    n_blocks = pl.cdiv(rows, row_tile)
    # Only shard across TensorCores when the chip actually has two of them.
    num_shards = 2 if (_num_tensorcores() >= 2 and n_blocks >= 2) else 1
    steps_per_shard = pl.cdiv(n_blocks, num_shards)
    last_block = n_blocks - 1

    def in_index(s, j, _valid_rows):
        # Clamp: with an odd block count split across 2 shards, the final grid
        # step re-reads the last block; the kernel masks its contribution to 0.
        return (jnp.minimum(s * steps_per_shard + j, last_block), 0)

    def out_index(s, j, _valid_rows):
        return (s, 0, 0)

    valid_rows = jnp.array([rows], dtype=jnp.int32)

    cost = pl.CostEstimate(
        flops=10 * rows * LANES,
        transcendentals=rows * LANES,
        bytes_accessed=rows * in_bytes_per_row + 2 * num_shards * 8 * LANES * 4,
    )

    inter_p, total_p = pl.pallas_call(
        _jaccard_kernel,
        out_shape=(
            jax.ShapeDtypeStruct((num_shards, 8, LANES), jnp.float32),
            jax.ShapeDtypeStruct((num_shards, 8, LANES), jnp.float32),
        ),
        grid_spec=pltpu.PrefetchScalarGridSpec(
            num_scalar_prefetch=1,
            grid=(num_shards, steps_per_shard),
            in_specs=[
                pl.BlockSpec((row_tile, LANES), in_index),
                pl.BlockSpec((row_tile, LANES), in_index),
            ],
            out_specs=[
                pl.BlockSpec((1, 8, LANES), out_index),
                pl.BlockSpec((1, 8, LANES), out_index),
            ],
        ),
        compiler_params=pltpu.CompilerParams(
            dimension_semantics=("parallel", "arbitrary"),
            vmem_limit_bytes=min(int(vmem_cap * 0.75), 96 << 20),
        ),
        cost_estimate=cost,
    )(valid_rows, logits2d, tgt2d)

    # Tiny epilogue in plain JAX: final cross-lane reductions + loss.
    inter = jnp.sum(inter_p)
    total = jnp.sum(total_p)
    union = total - inter  # == 0.5 * (A.sum() + B.sum() + C.sum())
    eps = 1e-09
    return 1.0 - inter / (union + eps)


def jaccard_loss_ref(output, target):
    pred = jax.nn.sigmoid(output.astype(jnp.float32))
    target = target.astype(jnp.float32)
    inter = jnp.sum(pred * target)
    a = jnp.sum(pred * (1.0 - target))
    b = jnp.sum(target * (1.0 - pred))
    c = jnp.sum(target + pred)
    union = 0.5 * (a + b + c)
    return 1.0 - inter / (union + 1e-09)


if __name__ == "__main__":
    key = jax.random.PRNGKey(0)
    k1, k2 = jax.random.split(key)
    # NCHW inputs, as the PyTorch module would receive.
    output = jax.random.normal(k1, (2, 4, 16, 16), dtype=jnp.float32)
    target = (jax.random.uniform(k2, (2, 4, 16, 16)) > 0.5).astype(jnp.float32)

    loss = jaccard_loss(output, target)
    jax.block_until_ready(loss)

    ref = jaccard_loss_ref(output, target)
    assert jnp.allclose(loss, ref, atol=1e-5, rtol=1e-5), (loss, ref)
    print("KERNEL_OK")
</pallas_src>

<mosaic_0001>
module attributes {stable_mosaic.version = 11 : i64} {
  func.func @_jaccard_kernel(%arg0: i32, %arg1: i32, %arg2: memref<1xi32, #tpu.memory_space<smem>>, %arg3: memref<16x128xf32, #tpu.memory_space<vmem>>, %arg4: memref<16x128xf32, #tpu.memory_space<vmem>>, %arg5: memref<1x8x128xf32, #tpu.memory_space<vmem>>, %arg6: memref<1x8x128xf32, #tpu.memory_space<vmem>>) attributes {dimension_semantics = [#tpu.dimension_semantics<parallel>, #tpu.dimension_semantics<arbitrary>], iteration_bounds = array<i64: 1, 1>, scalar_prefetch = 1 : i64, scratch_operands = 0 : i64, tpu.core_type = #tpu.core_type<tc>, window_params = [{transform_indices = @transform_0, window_bounds = array<i64: 16, 128>}, {transform_indices = @transform_1, window_bounds = array<i64: 16, 128>}, {transform_indices = @transform_2, window_bounds = array<i64: 1, 8, 128>}, {transform_indices = @transform_3, window_bounds = array<i64: 1, 8, 128>}]} {
    %c0_i32 = arith.constant 0 : i32
    %0 = arith.cmpi eq, %arg1, %c0_i32 : i32
    %1 = arith.extui %0 : i1 to i32
    %c0_i32_0 = arith.constant 0 : i32
    %2 = arith.cmpi ne, %1, %c0_i32_0 : i32
    scf.if %2 {
      %cst_23 = arith.constant 0.000000e+00 : f32
      %42 = vector.broadcast %cst_23 : f32 to vector<1x8x128xf32>
      %c0_24 = arith.constant 0 : index
      %c0_25 = arith.constant 0 : index
      %c0_26 = arith.constant 0 : index
      %43 = vector.load %arg5[%c0_24, %c0_25, %c0_26] : memref<1x8x128xf32, #tpu.memory_space<vmem>>, vector<1x8x128xf32>
      tpu.vector_store %arg5[%c0_24, %c0_25, %c0_26], %42 {strides = array<i32>} : memref<1x8x128xf32, #tpu.memory_space<vmem>>, vector<1x8x128xf32>,
      %cst_27 = arith.constant 0.000000e+00 : f32
      %44 = vector.broadcast %cst_27 : f32 to vector<1x8x128xf32>
      %c0_28 = arith.constant 0 : index
      %c0_29 = arith.constant 0 : index
      %c0_30 = arith.constant 0 : index
      %45 = vector.load %arg6[%c0_28, %c0_29, %c0_30] : memref<1x8x128xf32, #tpu.memory_space<vmem>>, vector<1x8x128xf32>
      tpu.vector_store %arg6[%c0_28, %c0_29, %c0_30], %44 {strides = array<i32>} : memref<1x8x128xf32, #tpu.memory_space<vmem>>, vector<1x8x128xf32>,
    } else {
    }
    %c1_i32 = arith.constant 1 : i32
    %3 = arith.muli %arg0, %c1_i32 : i32
    %4 = arith.addi %3, %arg1 : i32
    %c0 = arith.constant 0 : index
    %5 = memref.load %arg2[%c0] : memref<1xi32, #tpu.memory_space<smem>>
    %c16_i32 = arith.constant 16 : i32
    %6 = arith.muli %4, %c16_i32 : i32
    %7 = arith.subi %5, %6 : i32
    %c0_1 = arith.constant 0 : index
    %c0_2 = arith.constant 0 : index
    %8 = vector.load %arg3[%c0_1, %c0_2] : memref<16x128xf32, #tpu.memory_space<vmem>>, vector<16x128xf32>
    %c0_3 = arith.constant 0 : index
    %c0_4 = arith.constant 0 : index
    %9 = vector.load %arg4[%c0_3, %c0_4] : memref<16x128xf32, #tpu.memory_space<vmem>>, vector<16x128xf32>
    %cst = arith.constant 5.000000e-01 : f32
    %10 = vector.broadcast %cst : f32 to vector<16x128xf32>
    %11 = arith.mulf %10, %8 : vector<16x128xf32>
    %12 = math.tanh %11 : vector<16x128xf32>
    %cst_5 = arith.constant 1.000000e+00 : f32
    %13 = vector.broadcast %cst_5 : f32 to vector<16x128xf32>
    %14 = arith.addf %12, %13 : vector<16x128xf32>
    %cst_6 = arith.constant 5.000000e-01 : f32
    %15 = vector.broadcast %cst_6 : f32 to vector<16x128xf32>
    %16 = arith.mulf %15, %14 : vector<16x128xf32>
    %17 = tpu.iota {dimensions = array<i32: 0>} : vector<16x128xi32>
    %18 = vector.broadcast %7 : i32 to vector<16x128xi32>
    %19 = arith.cmpi slt, %17, %18 : vector<16x128xi32>
    %20 = arith.mulf %16, %9 : vector<16x128xf32>
    %cst_7 = arith.constant 0.000000e+00 : f32
    %21 = vector.broadcast %cst_7 : f32 to vector<16x128xf32>
    %22 = arith.select %19, %20, %21 : vector<16x128xi1>, vector<16x128xf32>
    %23 = arith.addf %16, %9 : vector<16x128xf32>
    %cst_8 = arith.constant 0.000000e+00 : f32
    %24 = vector.broadcast %cst_8 : f32 to vector<16x128xf32>
    %25 = arith.select %19, %23, %24 : vector<16x128xi1>, vector<16x128xf32>
    %c0_9 = arith.constant 0 : index
    %c0_10 = arith.constant 0 : index
    %c0_11 = arith.constant 0 : index
    %26 = vector.load %arg5[%c0_9, %c0_10, %c0_11] : memref<1x8x128xf32, #tpu.memory_space<vmem>>, vector<1x8x128xf32>
    %27 = vector.shape_cast %26 : vector<1x8x128xf32> to vector<8x128xf32>
    %28 = vector.shape_cast %22 : vector<16x128xf32> to vector<2x8x128xf32>
    %cst_12 = arith.constant dense<0.000000e+00> : vector<8x128xf32>
    %29 = vector.multi_reduction <add>, %28, %cst_12 [0] : vector<2x8x128xf32> to vector<8x128xf32>
    %30 = arith.addf %27, %29 : vector<8x128xf32>
    %c0_13 = arith.constant 0 : index
    %c0_14 = arith.constant 0 : index
    %c0_15 = arith.constant 0 : index
    %31 = vector.load %arg5[%c0_13, %c0_14, %c0_15] : memref<1x8x128xf32, #tpu.memory_space<vmem>>, vector<1x8x128xf32>
    %32 = vector.shape_cast %31 : vector<1x8x128xf32> to vector<8x128xf32>
    %33 = vector.shape_cast %30 : vector<8x128xf32> to vector<1x8x128xf32>
    tpu.vector_store %arg5[%c0_13, %c0_14, %c0_15], %33 {strides = array<i32>} : memref<1x8x128xf32, #tpu.memory_space<vmem>>, vector<1x8x128xf32>,
    %c0_16 = arith.constant 0 : index
    %c0_17 = arith.constant 0 : index
    %c0_18 = arith.constant 0 : index
    %34 = vector.load %arg6[%c0_16, %c0_17, %c0_18] : memref<1x8x128xf32, #tpu.memory_space<vmem>>, vector<1x8x128xf32>
    %35 = vector.shape_cast %34 : vector<1x8x128xf32> to vector<8x128xf32>
    %36 = vector.shape_cast %25 : vector<16x128xf32> to vector<2x8x128xf32>
    %cst_19 = arith.constant dense<0.000000e+00> : vector<8x128xf32>
    %37 = vector.multi_reduction <add>, %36, %cst_19 [0] : vector<2x8x128xf32> to vector<8x128xf32>
    %38 = arith.addf %35, %37 : vector<8x128xf32>
    %c0_20 = arith.constant 0 : index
    %c0_21 = arith.constant 0 : index
    %c0_22 = arith.constant 0 : index
    %39 = vector.load %arg6[%c0_20, %c0_21, %c0_22] : memref<1x8x128xf32, #tpu.memory_space<vmem>>, vector<1x8x128xf32>
    %40 = vector.shape_cast %39 : vector<1x8x128xf32> to vector<8x128xf32>
    %41 = vector.shape_cast %38 : vector<8x128xf32> to vector<1x8x128xf32>
    tpu.vector_store %arg6[%c0_20, %c0_21, %c0_22], %41 {strides = array<i32>} : memref<1x8x128xf32, #tpu.memory_space<vmem>>, vector<1x8x128xf32>,
    return
  }
  func.func @transform_0(%arg0: i32, %arg1: i32, %arg2: memref<1xi32, #tpu.memory_space<smem>>) -> (i32, i32) {
    %c1_i32 = arith.constant 1 : i32
    %0 = arith.muli %arg0, %c1_i32 : i32
    %1 = arith.addi %0, %arg1 : i32
    %c0_i32 = arith.constant 0 : i32
    %2 = arith.minsi %1, %c0_i32 : i32
    %c0_i32_0 = arith.constant 0 : i32
    %c0_i32_1 = arith.constant 0 : i32
    return %2, %c0_i32_0 : i32, i32
  }
  func.func @transform_1(%arg0: i32, %arg1: i32, %arg2: memref<1xi32, #tpu.memory_space<smem>>) -> (i32, i32) {
    %c1_i32 = arith.constant 1 : i32
    %0 = arith.muli %arg0, %c1_i32 : i32
    %1 = arith.addi %0, %arg1 : i32
    %c0_i32 = arith.constant 0 : i32
    %2 = arith.minsi %1, %c0_i32 : i32
    %c0_i32_0 = arith.constant 0 : i32
    %c0_i32_1 = arith.constant 0 : i32
    return %2, %c0_i32_0 : i32, i32
  }
  func.func @transform_2(%arg0: i32, %arg1: i32, %arg2: memref<1xi32, #tpu.memory_space<smem>>) -> (i32, i32, i32) {
    %c0_i32 = arith.constant 0 : i32
    %c0_i32_0 = arith.constant 0 : i32
    %c0_i32_1 = arith.constant 0 : i32
    return %arg0, %c0_i32, %c0_i32_0 : i32, i32, i32
  }
  func.func @transform_3(%arg0: i32, %arg1: i32, %arg2: memref<1xi32, #tpu.memory_space<smem>>) -> (i32, i32, i32) {
    %c0_i32 = arith.constant 0 : i32
    %c0_i32_0 = arith.constant 0 : i32
    %c0_i32_1 = arith.constant 0 : i32
    return %arg0, %c0_i32, %c0_i32_0 : i32, i32, i32
  }
}

</mosaic_0001>

<bundles_post_ra>
// kernel: tpu_custom_call.1
= control target key start
LH: loop header
LB: loop body
LE: loop exit
PB: predicated region body
PF: predicated region fallthrough
CT: control target
= control target key end

     0   :  { %11 = vsyncpa [#allocation5], 0  ;;  %s288_s0 = inlined_call_operand.<no memory space> [shape: s32[1], index: 0, kind: input, shape index: {}]   ;;  %s289_s1 = inlined_call_operand.hbm [shape: f32[16,128], index: 1, kind: input, shape index: {}]   ;;  %s290_s2 = inlined_call_operand.hbm [shape: f32[16,128], index: 2, kind: input, shape index: {}]   ;;  %s291_s3 = inlined_call_operand.hbm [shape: f32[1,8,128], index: 3, kind: output, shape index: {0}]   ;;  %s292_s4 = inlined_call_operand.hbm [shape: f32[1,8,128], index: 4, kind: output, shape index: {1}]  }
   0x1   :  { %12 = vsyncpa [#allocation8], 0 }
   0x2   :  { %13 = vsyncpa [#allocation6], 0 }
   0x3   :  { %14 = vsyncpa [#allocation11], 0  ;;  %s242_s15 = smov [#allocation4]  }
   0x4   :  { %s26_s16 = sshll.u32 %s242_s15, 4  ;;  %s27_s16 = int_to_ptr.vmem [resolvable:$true] %s26_s16 }
   0x5   :  { %s162_s17 = scalar_lea.vmem %s27_s16, 256  ;;  %p167_p1 = scmp.lt.s32.totalorder %s27_s16, %s27_s16 }
   0x6   :  { %p163_p0 = scmp.ne.s32.totalorder %s27_s16, %s162_s17  ;;  %p168_p2 = scmp.lt.s32.totalorder %s162_s17, %s162_s17 }
   0x8   :  { %p169_p3 = por %p168_p2, %p167_p1 }
   0xa   :  { %p170_p4 = pnand %p169_p3, %p163_p0 }
   0xc   :  { %173 = shalt.err (!%p170_p4)
}
   0xd   :  { %s243_s18 = smov 128   ;;  %s244_s19 = smov 8  }
   0xe   :  { %32 = dma.hbm_to_vmem [thread:$0]  %s289_s1, 256, %s27_s16, [#allocation5], %s243_s18, %s243_s18, %s244_s19  }
   0xf   :  { %s245_s22 = smov [#allocation7]  }
  0x10   :  { %s44_s23 = sshll.u32 %s245_s22, 4  ;;  %s45_s23 = int_to_ptr.vmem [resolvable:$true] %s44_s23 }
  0x11   :  { %s182_s24 = scalar_lea.vmem %s45_s23, 256  ;;  %p187_p6 = scmp.lt.s32.totalorder %s45_s23, %s45_s23 }
  0x12   :  { %p183_p5 = scmp.ne.s32.totalorder %s45_s23, %s182_s24  ;;  %p188_p7 = scmp.lt.s32.totalorder %s182_s24, %s182_s24 }
  0x14   :  { %p189_p8 = por %p188_p7, %p187_p6 }
  0x16   :  { %p190_p9 = pnand %p189_p8, %p183_p5 }
  0x18   :  { %193 = shalt.err (!%p190_p9)
}
  0x19   :  { %50 = dma.hbm_to_vmem [thread:$0]  %s290_s2, 256, %s45_s23, [#allocation8], %s243_s18, %s243_s18, %s244_s19  }
  0x1a   :  { %234 = dma.done.wait [#allocation5], 256  }
  0x1b   :  { %235 = vsyncadd [#allocation5], 4294967040 }
  0x1c   :  { %236 = dma.done.wait [#allocation8], 256  }
  0x1d   :  { %237 = vsyncadd [#allocation8], 4294967040  ;;  %v75_v0 = vld [vmem:[#allocation4] sm:$0xff]  ;;  %v76_v1 = vld [vmem:[#allocation4 + $0x8] sm:$0xff]  ;;  %v87_v4 = vlaneseq  ;;  %v90_v10 = vstv %s288_s0  ;;  %s246_s2 = smov [#allocation9]   ;;  %s247_s0 = smov [#allocation10]  }
  0x1e   :  { %v79_v2 = vmul.f32 0.5, %v75_v0  ;;  %v80_v3 = vmul.f32 0.5, %v76_v1  ;;  %v77_v11 = vld [vmem:[#allocation7] sm:$0xff]  ;;  %v78_v13 = vld [vmem:[#allocation7 + $0x8] sm:$0xff]  ;;  %s115_s28 = sshll.u32 %s246_s2, 4  ;;  %s125_s29 = sshll.u32 %s247_s0, 4  ;;  %s116_s28 = int_to_ptr.vmem [resolvable:$true] %s115_s28  ;;  %s126_s29 = int_to_ptr.vmem [resolvable:$true] %s125_s29 }
  0x1f   :  { %v88_v5 = vshrl.u32 %v87_v4, 7  ;;  %s194_s30 = scalar_lea.vmem %s116_s28, 128  ;;  %p199_p11 = scmp.lt.s32.totalorder %s116_s28, %s116_s28 }
  0x20   :  { %150 = vtanh.f32 %v79_v2  ;;  %p195_p10 = scmp.ne.s32.totalorder %s116_s28, %s194_s30  ;;  %p200_p12 = scmp.lt.s32.totalorder %s194_s30, %s194_s30 }
  0x21   :  { %152 = vtanh.f32 %v80_v3  ;;  %v89_v9 = vadd.s32 8, %v88_v5  ;;  %vm91_vm0 = vcmp.lt.s32.totalorder %v88_v5, %v90_v10 }
  0x22   :  { %p201_p13 = por %p200_p12, %p199_p11 }
  0x23   :  { %vm92_vm1 = vcmp.lt.s32.totalorder %v89_v9, %v90_v10 }
  0x24   :  { %p202_p0 = pnand %p201_p13, %p195_p10 }
  0x2d   :  { %v151_v6 = vpop.eup %150 }
  0x2e   :  { %v153_v7 = vpop.eup %152  ;;  %v83_v8 = vadd.f32 1.0, %v151_v6 }
  0x2f   :  { %v84_v12 = vadd.f32 1.0, %v153_v7 }
  0x30   :  { %v85_v14 = vmul.f32 0.5, %v83_v8 }
  0x31   :  { %v86_v15 = vmul.f32 0.5, %v84_v12 }
  0x32   :  { %v93_v16 = vmul.f32 %v85_v14, %v77_v11  ;;  %v97_v17 = vadd.f32 %v85_v14, %v77_v11 }
  0x33   :  { %v94_v18 = vmul.f32 %v86_v15, %v78_v13  ;;  %v98_v19 = vadd.f32 %v86_v15, %v78_v13 }
  0x34   :  { %v95_v20 = vsel %vm91_vm0, %v93_v16, 0.0  ;;  %v99_v21 = vsel %vm91_vm0, %v97_v17, 0.0 }
  0x35   :  { %v96_v22 = vsel %vm92_vm1, %v94_v18, 0.0  ;;  %v100_v23 = vsel %vm92_vm1, %v98_v19, 0.0 }
  0x36   :  { %v102_v24 = vadd.f32 %v96_v22, %v95_v20  ;;  %v106_v25 = vadd.f32 %v100_v23, %v99_v21 }
  0x38   :  { %104 = vst [vmem:[#allocation9] sm:$0xff] %v102_v24  ;;  %108 = vst [vmem:[#allocation10] sm:$0xff] %v106_v25 }
  0x39   :  { %205 = shalt.err (!%p202_p0)
}
  0x3a   :  { %118 = dma.vmem_to_hbm [thread:$0]  %s116_s28, 128, %s291_s3, [#allocation6]  }
  0x3b   :  { %s214_s7 = scalar_lea.vmem %s126_s29, 128  ;;  %p219_p2 = scmp.lt.s32.totalorder %s126_s29, %s126_s29 }
  0x3c   :  { %p215_p1 = scmp.ne.s32.totalorder %s126_s29, %s214_s7  ;;  %p220_p3 = scmp.lt.s32.totalorder %s214_s7, %s214_s7 }
  0x3e   :  { %p221_p4 = por %p220_p3, %p219_p2 }
  0x40   :  { %p222_p5 = pnand %p221_p4, %p215_p1 }
  0x42   :  { %225 = shalt.err (!%p222_p5)
}
  0x43   :  { %128 = dma.vmem_to_hbm [thread:$0]  %s126_s29, 128, %s292_s4, [#allocation11]  }
  0x44   :  { %238 = dma.done.wait [#allocation6], 128  }
  0x45   :  { %239 = vsyncadd [#allocation6], 4294967168 }
  0x46   :  { %240 = dma.done.wait [#allocation11], 128  }
  0x47   :  { %241 = vsyncadd [#allocation11], 4294967168 }
  0x48   :  { %135 = vsyncpa [#allocation5], 1 }
  0x49   :  { %136 = vsyncpa [#allocation8], 1 }
  0x4a   :  { %137 = vsyncpa [#allocation6], 1 }
  0x4b   :  { %138 = vsyncpa [#allocation11], 1 }

</bundles_post_ra>
